<compile_context>
chip_gen: v7x
topology: tpu7x:2x2x1
jax: 0.10.0
libtpu: 0.0.40
codegen_flags: <defaults>
</compile_context>

<pallas_src>
import functools

import jax
import jax.numpy as jnp
import numpy as np
from jax.experimental import pallas as pl
from jax.experimental.pallas import tpu as pltpu


def _sca_kernel(x_ref, w1t_ref, scale_ref, bias_ref, w2t_ref, out_ref, acc_ref,
                *, hw):
    """Grid = (batch tiles, spatial tiles).  Spatial axis is a reduction.

    x_ref     : (Nb, C, ts)  VMEM   input tile (spatial flattened & tiled)
    w1t_ref   : (C, O)       VMEM   fc1 weight, transposed
    scale_ref : (1, O)       VMEM   folded BN scale  (gamma / sqrt(var+eps))
    bias_ref  : (1, O)       VMEM   folded BN bias   (beta - mean*scale)
    w2t_ref   : (O, F)       VMEM   fc2 weight, transposed
    out_ref   : (Nb, F)      VMEM   softmax output (written on last spatial step)
    acc_ref   : (Nb, C)      VMEM   running spatial sum (scratch)
    """
    s = pl.program_id(1)

    @pl.when(s == 0)
    def _():
        acc_ref[...] = jnp.zeros_like(acc_ref)

    # Partial global-average-pool: sum this spatial tile over lanes.
    acc_ref[...] += jnp.sum(x_ref[...], axis=-1)                     # (Nb, C)

    @pl.when(s == pl.num_programs(1) - 1)
    def _():
        pooled = acc_ref[...] * (1.0 / hw)                           # (Nb, C)

        # fc1 (1x1 conv, no bias) on the MXU.
        h = jnp.dot(pooled, w1t_ref[...],
                    preferred_element_type=jnp.float32,
                    precision=jax.lax.Precision.HIGHEST)             # (Nb, O)
        # BatchNorm (eval mode, folded to affine) + ReLU.
        h = h * scale_ref[...] + bias_ref[...]
        h = jnp.maximum(h, 0.0)

        # fc2 (1x1 conv, no bias) on the MXU.
        logits = jnp.dot(h, w2t_ref[...],
                         preferred_element_type=jnp.float32,
                         precision=jax.lax.Precision.HIGHEST)        # (Nb, F)

        # Softmax over the feature (channel) axis.
        m = jnp.max(logits, axis=-1, keepdims=True)
        e = jnp.exp(logits - m)
        out_ref[...] = e / jnp.sum(e, axis=-1, keepdims=True)


def scale_channel_attention(x_nchw, w1, w2, bn_gamma, bn_beta, bn_mean, bn_var,
                            *, eps=1e-5, block_hw=2048):
    """x_nchw: (N, C, H, W);  w1: (O, C);  w2: (F, O);  BN params: (O,).
    Returns softmax attention of shape (N, F, 1, 1)."""
    N, C, H, W = x_nchw.shape
    O = w1.shape[0]
    Fnum = w2.shape[0]
    HW = H * W
    x_flat = x_nchw.reshape(N, C, HW)

    # Batch tile: 8 images per step when possible, otherwise the whole batch.
    Nb = 8 if (N % 8 == 0) else N

    # Spatial tile: a multiple of 128 that divides HW (lane-aligned blocks),
    # otherwise fall back to the full extent.
    if HW % 128 == 0:
        ts = max(128, min(block_hw, HW) // 128 * 128)
        while HW % ts != 0:
            ts -= 128
    else:
        ts = HW

    # Fold BatchNorm (inference) into a per-feature scale/bias.
    scale = (bn_gamma / jnp.sqrt(bn_var + eps)).reshape(1, O).astype(jnp.float32)
    bias = (bn_beta - bn_mean * (bn_gamma / jnp.sqrt(bn_var + eps))
            ).reshape(1, O).astype(jnp.float32)
    w1t = w1.T.astype(jnp.float32)          # (C, O)
    w2t = w2.T.astype(jnp.float32)          # (O, F)

    kernel = functools.partial(_sca_kernel, hw=HW)

    out = pl.pallas_call(
        kernel,
        out_shape=jax.ShapeDtypeStruct((N, Fnum), jnp.float32),
        grid_spec=pltpu.PrefetchScalarGridSpec(
            num_scalar_prefetch=0,
            grid=(N // Nb, HW // ts),
            in_specs=[
                pl.BlockSpec((Nb, C, ts), lambda b, s: (b, 0, s)),
                pl.BlockSpec((C, O), lambda b, s: (0, 0)),
                pl.BlockSpec((1, O), lambda b, s: (0, 0)),
                pl.BlockSpec((1, O), lambda b, s: (0, 0)),
                pl.BlockSpec((O, Fnum), lambda b, s: (0, 0)),
            ],
            out_specs=pl.BlockSpec((Nb, Fnum), lambda b, s: (b, 0)),
            scratch_shapes=[pltpu.VMEM((Nb, C), jnp.float32)],
        ),
        compiler_params=pltpu.CompilerParams(
            dimension_semantics=("parallel", "arbitrary")),
    )(x_flat.astype(jnp.float32), w1t, scale, bias, w2t)

    return out.reshape(N, Fnum, 1, 1)


def _reference(x, w1, w2, gamma, beta, rmean, rvar, eps=1e-5):
    """Pure-JAX reference matching the PyTorch forward (BN in eval mode)."""
    pooled = jnp.mean(x, axis=(2, 3))                                # (N, C)
    h = jnp.einsum('oc,nc->no', w1, pooled, precision='highest')     # (N, O)
    h = gamma * (h - rmean) / jnp.sqrt(rvar + eps) + beta
    h = jax.nn.relu(h)
    logits = jnp.einsum('fo,no->nf', w2, h, precision='highest')     # (N, F)
    sm = jax.nn.softmax(logits, axis=-1)
    return sm[:, :, None, None]                                      # (N, F, 1, 1)


def _kaiming(key, shape):
    # kaiming_normal_(mode='fan_out', nonlinearity='relu') for Conv2d weights
    # shape = (out_c, in_c, kh, kw); fan_out = out_c * kh * kw
    fan_out = shape[0] * shape[2] * shape[3]
    std = (2.0 / fan_out) ** 0.5
    return std * jax.random.normal(key, shape, jnp.float32)


if __name__ == "__main__":
    # module config: in_planes=4, out_planes=2, num_features=4
    N, C, O, Fnum, H, W = 2, 4, 2, 4, 16, 16

    key = jax.random.PRNGKey(0)
    k1, k2, k3, k4, kx = jax.random.split(key, 5)

    w1 = _kaiming(k1, (O, C, 1, 1))[:, :, 0, 0]          # fc1 weight (O, C)
    w2 = _kaiming(k2, (Fnum, O, 1, 1))[:, :, 0, 0]       # fc2 weight (F, O)

    # BN params: module init is gamma=1, beta=0; use non-trivial running stats
    # (as if a trained model in eval mode) to exercise the folded BN path.
    gamma = jnp.ones((O,), jnp.float32)
    beta = jnp.zeros((O,), jnp.float32)
    rmean = 0.1 * jax.random.normal(k3, (O,), jnp.float32)
    rvar = jnp.abs(jax.random.normal(k4, (O,), jnp.float32)) + 0.5

    x = jax.random.normal(kx, (N, C, H, W), jnp.float32)

    # block_hw=128 -> two spatial tiles, exercising the accumulator path.
    out = scale_channel_attention(x, w1, w2, gamma, beta, rmean, rvar,
                                  block_hw=128)
    out = jax.block_until_ready(out)

    ref = _reference(x, w1, w2, gamma, beta, rmean, rvar)
    np.testing.assert_allclose(np.asarray(out), np.asarray(ref),
                               rtol=1e-5, atol=1e-5)

    print("KERNEL_OK")
</pallas_src>

<mosaic_0001>
module attributes {stable_mosaic.version = 11 : i64} {
  func.func @_sca_kernel(%arg0: i32, %arg1: i32, %arg2: memref<2x4x128xf32, #tpu.memory_space<vmem>>, %arg3: memref<4x2xf32, #tpu.memory_space<vmem>>, %arg4: memref<1x2xf32, #tpu.memory_space<vmem>>, %arg5: memref<1x2xf32, #tpu.memory_space<vmem>>, %arg6: memref<2x4xf32, #tpu.memory_space<vmem>>, %arg7: memref<2x4xf32, #tpu.memory_space<vmem>>, %arg8: memref<2x4xf32, #tpu.memory_space<vmem>>) attributes {dimension_semantics = [#tpu.dimension_semantics<parallel>, #tpu.dimension_semantics<arbitrary>], iteration_bounds = array<i64: 1, 2>, scalar_prefetch = 0 : i64, scratch_operands = 1 : i64, tpu.core_type = #tpu.core_type<tc>, window_params = [{transform_indices = @transform_0, window_bounds = array<i64: 2, 4, 128>}, {pipeline_mode = #tpu.pipeline_mode<synchronous>, transform_indices = @transform_1, window_bounds = array<i64: 4, 2>}, {pipeline_mode = #tpu.pipeline_mode<synchronous>, transform_indices = @transform_2, window_bounds = array<i64: 1, 2>}, {pipeline_mode = #tpu.pipeline_mode<synchronous>, transform_indices = @transform_3, window_bounds = array<i64: 1, 2>}, {pipeline_mode = #tpu.pipeline_mode<synchronous>, transform_indices = @transform_4, window_bounds = array<i64: 2, 4>}, {transform_indices = @transform_5, window_bounds = array<i64: 2, 4>}]} {
    %c0_i32 = arith.constant 0 : i32
    %0 = arith.cmpi eq, %arg1, %c0_i32 : i32
    %1 = arith.extui %0 : i1 to i32
    %c0_i32_0 = arith.constant 0 : i32
    %2 = arith.cmpi ne, %1, %c0_i32_0 : i32
    scf.if %2 {
      %cst_8 = arith.constant 0.000000e+00 : f32
      %11 = vector.broadcast %cst_8 : f32 to vector<2x4xf32>
      %c0_9 = arith.constant 0 : index
      %c0_10 = arith.constant 0 : index
      %12 = vector.load %arg8[%c0_9, %c0_10] : memref<2x4xf32, #tpu.memory_space<vmem>>, vector<2x4xf32>
      tpu.vector_store %arg8[%c0_9, %c0_10], %11 {strides = array<i32>} : memref<2x4xf32, #tpu.memory_space<vmem>>, vector<2x4xf32>,
    } else {
    }
    %c0 = arith.constant 0 : index
    %c0_1 = arith.constant 0 : index
    %3 = vector.load %arg8[%c0, %c0_1] : memref<2x4xf32, #tpu.memory_space<vmem>>, vector<2x4xf32>
    %c0_2 = arith.constant 0 : index
    %c0_3 = arith.constant 0 : index
    %c0_4 = arith.constant 0 : index
    %4 = vector.load %arg2[%c0_2, %c0_3, %c0_4] : memref<2x4x128xf32, #tpu.memory_space<vmem>>, vector<2x4x128xf32>
    %cst = arith.constant dense<0.000000e+00> : vector<2x4xf32>
    %5 = vector.multi_reduction <add>, %4, %cst [2] : vector<2x4x128xf32> to vector<2x4xf32>
    %6 = arith.addf %3, %5 : vector<2x4xf32>
    %c0_5 = arith.constant 0 : index
    %c0_6 = arith.constant 0 : index
    %7 = vector.load %arg8[%c0_5, %c0_6] : memref<2x4xf32, #tpu.memory_space<vmem>>, vector<2x4xf32>
    tpu.vector_store %arg8[%c0_5, %c0_6], %6 {strides = array<i32>} : memref<2x4xf32, #tpu.memory_space<vmem>>, vector<2x4xf32>,
    %c1_i32 = arith.constant 1 : i32
    %8 = arith.cmpi eq, %arg1, %c1_i32 : i32
    %9 = arith.extui %8 : i1 to i32
    %c0_i32_7 = arith.constant 0 : i32
    %10 = arith.cmpi ne, %9, %c0_i32_7 : i32
    scf.if %10 {
      %c0_8 = arith.constant 0 : index
      %c0_9 = arith.constant 0 : index
      %11 = vector.load %arg8[%c0_8, %c0_9] : memref<2x4xf32, #tpu.memory_space<vmem>>, vector<2x4xf32>
      %cst_10 = arith.constant 3.906250e-03 : f32
      %12 = vector.broadcast %cst_10 : f32 to vector<2x4xf32>
      %13 = arith.mulf %11, %12 : vector<2x4xf32>
      %c0_11 = arith.constant 0 : index
      %c0_12 = arith.constant 0 : index
      %14 = vector.load %arg3[%c0_11, %c0_12] : memref<4x2xf32, #tpu.memory_space<vmem>>, vector<4x2xf32>
      %cst_13 = arith.constant dense<0.000000e+00> : vector<2x2xf32>
      %15 = tpu.matmul %13, %14, %cst_13 {dimension_numbers = #tpu.dot_dimension_numbers<[1], [0], [0], [1], [0, 0, 1, 1], [], []>, precision = #tpu.contract_precision<fp32>} : vector<2x4xf32>, vector<4x2xf32>, vector<2x2xf32> -> vector<2x2xf32>
      %c0_14 = arith.constant 0 : index
      %c0_15 = arith.constant 0 : index
      %16 = vector.load %arg4[%c0_14, %c0_15] : memref<1x2xf32, #tpu.memory_space<vmem>>, vector<1x2xf32>
      %17 = vector.broadcast %16 : vector<1x2xf32> to vector<2x2xf32>
      %18 = arith.mulf %15, %17 : vector<2x2xf32>
      %c0_16 = arith.constant 0 : index
      %c0_17 = arith.constant 0 : index
      %19 = vector.load %arg5[%c0_16, %c0_17] : memref<1x2xf32, #tpu.memory_space<vmem>>, vector<1x2xf32>
      %20 = vector.broadcast %19 : vector<1x2xf32> to vector<2x2xf32>
      %21 = arith.addf %18, %20 : vector<2x2xf32>
      %cst_18 = arith.constant 0.000000e+00 : f32
      %22 = vector.broadcast %cst_18 : f32 to vector<2x2xf32>
      %23 = arith.maximumf %21, %22 : vector<2x2xf32>
      %c0_19 = arith.constant 0 : index
      %c0_20 = arith.constant 0 : index
      %24 = vector.load %arg6[%c0_19, %c0_20] : memref<2x4xf32, #tpu.memory_space<vmem>>, vector<2x4xf32>
      %cst_21 = arith.constant dense<0.000000e+00> : vector<2x4xf32>
      %25 = tpu.matmul %23, %24, %cst_21 {dimension_numbers = #tpu.dot_dimension_numbers<[1], [0], [0], [1], [0, 0, 1, 1], [], []>, precision = #tpu.contract_precision<fp32>} : vector<2x2xf32>, vector<2x4xf32>, vector<2x4xf32> -> vector<2x4xf32>
      %cst_22 = arith.constant dense<0xFF800000> : vector<2xf32>
      %26 = vector.multi_reduction <maximumf>, %25, %cst_22 [1] : vector<2x4xf32> to vector<2xf32>
      %27 = vector.shape_cast %26 : vector<2xf32> to vector<2x1xf32>
      %28 = vector.broadcast %27 : vector<2x1xf32> to vector<2x4xf32>
      %29 = arith.subf %25, %28 : vector<2x4xf32>
      %30 = math.exp %29 : vector<2x4xf32>
      %cst_23 = arith.constant dense<0.000000e+00> : vector<2xf32>
      %31 = vector.multi_reduction <add>, %30, %cst_23 [1] : vector<2x4xf32> to vector<2xf32>
      %32 = vector.shape_cast %31 : vector<2xf32> to vector<2x1xf32>
      %33 = vector.broadcast %32 : vector<2x1xf32> to vector<2x4xf32>
      %34 = arith.divf %30, %33 : vector<2x4xf32>
      %c0_24 = arith.constant 0 : index
      %c0_25 = arith.constant 0 : index
      %35 = vector.load %arg7[%c0_24, %c0_25] : memref<2x4xf32, #tpu.memory_space<vmem>>, vector<2x4xf32>
      tpu.vector_store %arg7[%c0_24, %c0_25], %34 {strides = array<i32>} : memref<2x4xf32, #tpu.memory_space<vmem>>, vector<2x4xf32>,
    } else {
    }
    return
  }
  func.func @transform_0(%arg0: i32, %arg1: i32) -> (i32, i32, i32) {
    %c0_i32 = arith.constant 0 : i32
    %c0_i32_0 = arith.constant 0 : i32
    return %arg0, %c0_i32, %arg1 : i32, i32, i32
  }
  func.func @transform_1(%arg0: i32, %arg1: i32) -> (i32, i32) {
    %c0_i32 = arith.constant 0 : i32
    %c0_i32_0 = arith.constant 0 : i32
    %c0_i32_1 = arith.constant 0 : i32
    return %c0_i32, %c0_i32_0 : i32, i32
  }
  func.func @transform_2(%arg0: i32, %arg1: i32) -> (i32, i32) {
    %c0_i32 = arith.constant 0 : i32
    %c0_i32_0 = arith.constant 0 : i32
    %c0_i32_1 = arith.constant 0 : i32
    return %c0_i32, %c0_i32_0 : i32, i32
  }
  func.func @transform_3(%arg0: i32, %arg1: i32) -> (i32, i32) {
    %c0_i32 = arith.constant 0 : i32
    %c0_i32_0 = arith.constant 0 : i32
    %c0_i32_1 = arith.constant 0 : i32
    return %c0_i32, %c0_i32_0 : i32, i32
  }
  func.func @transform_4(%arg0: i32, %arg1: i32) -> (i32, i32) {
    %c0_i32 = arith.constant 0 : i32
    %c0_i32_0 = arith.constant 0 : i32
    %c0_i32_1 = arith.constant 0 : i32
    return %c0_i32, %c0_i32_0 : i32, i32
  }
  func.func @transform_5(%arg0: i32, %arg1: i32) -> (i32, i32) {
    %c0_i32 = arith.constant 0 : i32
    %c0_i32_0 = arith.constant 0 : i32
    return %arg0, %c0_i32 : i32, i32
  }
}

</mosaic_0001>

<bundles_post_ra>
// kernel: tpu_custom_call.1
= control target key start
LH: loop header
LB: loop body
LE: loop exit
PB: predicated region body
PF: predicated region fallthrough
CT: control target
= control target key end

     0   :  { %10 = vsyncpa [#allocation4], 0  ;;  %s1852_s0 = inlined_call_operand.hbm [shape: f32[2,4,256], index: 0, kind: input, shape index: {}]   ;;  %s1853_s1 = inlined_call_operand.vmem [shape: f32[4,2], index: 1, kind: input, shape index: {}]   ;;  %s1854_s2 = inlined_call_operand.vmem [shape: f32[1,2], index: 2, kind: input, shape index: {}]   ;;  %s1855_s3 = inlined_call_operand.vmem [shape: f32[1,2], index: 3, kind: input, shape index: {}]   ;;  %s1856_s4 = inlined_call_operand.vmem [shape: f32[2,4], index: 4, kind: input, shape index: {}]   ;;  %s1857_s5 = inlined_call_operand.hbm [shape: f32[2,4], index: 5, kind: output, shape index: {}]  }
   0x1   :  { %12 = vsyncpa [#allocation4 + $0x1], 0 }
   0x2   :  { %13 = vsyncpa [#allocation5], 0  ;;  %s1644_s18 = smov 0   ;;  %s1646_s19 = smov 0  }
   0x3   :  { %s1648_s20 = smov 0   ;;  %s1650_s21 = smov 0  }
   0x4   :  { %s1652_s22 = smov 0   ;;  %s1654_s23 = smov 0  }
   0x5 LB: > { %s1303_s24 = sadd.s32 4294967295, %s1604_s23   ;;  %s28_s25 = sadd.s32 1, %s1600_s22  ;;  %s1604_s23 = sphi %s1654_s23, %s19_s23   ;;  %s1600_s22 = sphi %s1652_s22, %s1867_s22   ;;  %s1596_s21 = sphi %s1650_s21, %s1866_s21   ;;  %s1592_s20 = sphi %s1648_s20, %s1865_s20   ;;  %s1588_s19 = sphi %s1646_s19, %s1864_s19   ;;  %s1584_s18 = sphi %s1644_s18, %s1863_s18  }
   0x6   : > { %p29_p0 = scmp.ge.s32.totalorder %s28_s25, 2  ;;  %s40_s26 = sadd.s32 1, %s1592_s20 }
   0x7   : > { %p47_p1 = scmp.ne.s32.totalorder %s1592_s20, %s1588_s19  ;;  %p48_p2 = scmp.eq.s32.totalorder %s1604_s23, 0 }
   0x8   : > { %s1869_s25 = smov (%p29_p0, %s28_s25), 0  ;;  %p53_p4 = scmp.ne.s32.totalorder %s1588_s19, %s1584_s18 }
   0x9   : > { %p1680_p3 = por %p48_p2, %p47_p1  ;;  %s36_s28 = ssub.s32 %s1600_s22, %s1869_s25 }
   0xa   : > { %p54_p5 = scmp.eq.s32.totalorder %s1303_s24, 0  ;;  %p38_p6 = scmp.eq.s32.totalorder %s36_s28, 0 }
   0xb   : > { %p1432_p8 = scmp.lt.s32.totalorder %s1604_s23, 2  ;;  %s199_s6 = sand.u32 1, %s1592_s20  }
   0xc   : > { %p1689_p7 = por %p54_p5, %p53_p4  ;;  %s1307_s7 = sshll.u32 %s1600_s22, 6 }
   0xd   : > { %s1695_s30 = scalar_select %p38_p6, %s1592_s20, %s40_s26  }
   0xe   : > { %s1306_s8 = sshll.u32 %s199_s6, 3  ;;  %s1702_s11 = scalar_lea.hbm %s1852_s0, %s1307_s7 }
   0xf   : > { %s203_s12 = scalar_lea.vmem [#allocation3], %s1306_s8  ;;  %p1706_p9 = pnand %p1432_p8, %p1680_p3 }
  0x10   : > { %s212_s13 = sshll.u32 %s203_s12, 4  ;;  %s1713_s15 = scalar_lea.sflag [#allocation4], %s199_s6  ;;  %s1710_s13 = int_to_ptr.vmem [resolvable:$true] %s212_s13 }
  0x11   : > { %s1494_s16 = scalar_lea.hbm %s1702_s11, 128  ;;  %p1496_p12 = pneg %p1706_p9 }
  0x12   : > { %p1495_p11 = scmp.ne.s32.totalorder %s1702_s11, %s1494_s16  ;;  %s1499_s26 = scalar_lea.hbm %s1852_s0, 256 }
  0x13   : > { %p1500_p1 = scmp.lt.u32.totalorder %s1702_s11, %s1852_s0  ;;  %p1501_p2 = scmp.lt.u32.totalorder %s1499_s26, %s1494_s16 }
  0x14   : > { %p1497_p13 = pnand %p1496_p12, %p1495_p11  ;;  %p1503_p4 = scmp.lt.u32.totalorder %s1494_s16, %s1702_s11 }
  0x15   : > { %p1502_p3 = por %p1501_p2, %p1500_p1 }
  0x16   : > { %p1498_p0 = pneg %p1497_p13 }
  0x17   : > { %p1504_p5 = por %p1503_p4, %p1502_p3 }
  0x19   : > { %p1505_p6 = pnand %p1504_p5, %p1498_p0 }
  0x1b   : > { %1508 = shalt.err (!%p1505_p6)
}
  0x1c   : > { %s1509_s6 = scalar_lea.vmem %s1710_s13, 128  ;;  %s1606_s7 = smov [#allocation3]  }
  0x1d   : > { %p1510_p8 = scmp.ne.s32.totalorder %s1710_s13, %s1509_s6  ;;  %s1514_s8 = sshll.u32 %s1606_s7, 4  ;;  %s1515_s8 = int_to_ptr.vmem [resolvable:$false] %s1514_s8 }
  0x1e   : > { %s1516_s9 = scalar_lea.vmem %s1515_s8, 256  ;;  %p1517_p10 = scmp.lt.s32.totalorder %s1710_s13, %s1515_s8 }
  0x1f   : > { %p1512_p11 = pnand %p1510_p8, %p1496_p12  ;;  %p1518_p1 = scmp.lt.s32.totalorder %s1516_s9, %s1509_s6 }
  0x21   : > { %p1513_p13 = pneg %p1512_p11  ;;  %p1519_p2 = por %p1518_p1, %p1517_p10 }
  0x23   : > { %p1520_p3 = pnand %p1519_p2, %p1513_p13 }
  0x25   : > { %1523 = shalt.err (!%p1520_p3)
}
  0x26   : > { %s1607_s10 = smov 128   ;;  %s1608_s12 = smov 64  }
  0x27   : > { %s1609_s16 = smov 4   ;;  %p220_p12 = scmp.lt.s32.totalorder %s1604_s23, 3 }
  0x28   : > { %1431 = dma.hbm_to_vmem [thread:$0]  (!%p1706_p9), %s1702_s11, 128, %s1710_s13, %s1713_s15, %s1607_s10, %s1608_s12, %s1609_s16  }
  0x29   : > { %p1861_p0 = scmp.ge.s32.totalorder %s1604_s23, 1 }
  0x2b   : > { %p221_p4 = pnand %p1861_p0, %p220_p12 }
  0x2c   : > { %s226_s17 = sand.u32 (!%p221_p4), 1, %s1588_s19  }
  0x2d   : > { %224 = sbr.rel (%p221_p4) target bundleno = 1097 (0x449), region = 40  ;;  %s1309_s18 = sshll.u32 (!%p221_p4), %s226_s17, 3 }
  0x2e   : > { %s227_s26 = scalar_lea.sflag (!%p221_p4), [#allocation4], %s226_s17  ;;  %s230_s27 = scalar_lea.vmem (!%p221_p4), [#allocation3], %s1309_s18 }
  0x34   : > { %1575 = dma.done.wait (%p1689_p7), %s227_s26, 128  }
  0x35   : > { %1577 = vsyncadd (%p1689_p7), %s227_s26, 4294967168  ;;  %p1310_p10 = scmp.ne.s32.totalorder %s1596_s21, 0 }
  0x36   : > { %vm257_vm0 = vcmask (!%p1310_p10), 25600   ;;  %v1610_v0 = vmov (!%p1310_p10), 0.0  }
  0x37   : > { %256 = sbr.rel (%p1310_p10) target bundleno = 62 (0x3e), region = 48  ;;  %258 = vst.msk [vmem:[#allocation2] sm:$0x3] (!%p1310_p10), %vm257_vm0, %v1610_v0 }
  0x3e PF: > { %v260_v1 = vld [vmem:[%s230_s27] sm:$0xf]  ;;  %vm262_vm1 = vcmask 1043456   ;;  %v261_v2 = vld [vmem:[%s230_s27 + $0x4] sm:$0xf]  ;;  %v271_v5 = vlaneseq  ;;  %vm281_vm2 = vcmask 1041409  }
  0x3f   : > { %v263_v3 = vsel %vm262_vm1, %v260_v1, 0.0  ;;  %v266_v4 = vsel %vm262_vm1, %v261_v2, 0.0  ;;  %v259_v12 = vld [vmem:[#allocation2] sm:$0x3]  ;;  %vm285_vm3 = vcmask 25600   ;;  %p1311_p7 = scmp.ne.s32.totalorder %s1596_s21, 1 }
  0x40   : > { %264 = vadd.xlane.f32.xlu0 %v263_v3  ;;  %v272_v6 = vand.u32 127, %v271_v5  ;;  %v274_v7 = vshrl.u32 %v271_v5, 7  ;;  %v293_v16 = vld [vmem:[%s1853_s1] sm:$0xf] (!%p1311_p7)  ;;  %v1611_v18 = vmov (!%p1311_p7), 0.0   ;;  %vm1612_vm4 = vmmov (!%p1311_p7), 0  }
  0x41   : > { %1342 = vmatprep.subr.mxu0 (!%p1311_p7), %v1611_v18  ;;  %v299_v19 = vsel (!%p1311_p7), %vm262_vm1, %v293_v16, 0  ;;  %1344 = vmatprep.mubr.msk.f32.mxu0 (!%p1311_p7), %vm1612_vm4, %v1611_v18  ;;  %vm294_vm5 = vcmask (!%p1311_p7), 31744   ;;  %v764_v32 = vld [vmem:[%s1856_s4] sm:$0x3] (!%p1311_p7)  ;;  %vm769_vm6 = vcmask (!%p1311_p7), 1041408   ;;  %vm765_vm7 = vcmask (!%p1311_p7), 15360  }
  0x42   : > { %v275_v9 = vsub.s32 %v272_v6, %v274_v7  ;;  %v302_v21 = vand.u32 (!%p1311_p7), 4294901760, %v299_v19  ;;  %1372 = vmatprep.subr.mxu1 (!%p1311_p7), %v1611_v18  ;;  %1374 = vmatprep.mubr.msk.f32.mxu1 (!%p1311_p7), %vm1612_vm4, %v1611_v18  ;;  %v771_v33 = vsel (!%p1311_p7), %vm769_vm6, %v764_v32, 0  ;;  %v1312_v35 = vld [vmem:[%s1854_s2] ss:$0 sm:$0xff] (!%p1311_p7) }
  0x43   : > { %v774_v34 = vand.u32 (!%p1311_p7), 4294901760, %v771_v33  ;;  %v1313_v37 = vld [vmem:[%s1855_s3] ss:$0 sm:$0xff] (!%p1311_p7) }
  0x44   : > { %267 = vadd.xlane.f32.xlu0 %v266_v4  ;;  %1343 = vmatpush3.msra.mxu0 (!%p1311_p7), %v302_v21  ;;  %v379_v23 = vsub.f32 (!%p1311_p7), %v299_v19, %v302_v21 }
  0x45   : > { %1347 = vmatprep.subr.mxu0 (!%p1311_p7), %v1611_v18  ;;  %1373 = vmatpush3.msra.mxu1 (!%p1311_p7), %v774_v34  ;;  %v851_v41 = vsub.f32 (!%p1311_p7), %v771_v33, %v774_v34 }
  0x46   : > { %v380_v26 = vand.u32 (!%p1311_p7), 4294901760, %v379_v23  ;;  %1377 = vmatprep.subr.mxu1 (!%p1311_p7), %v1611_v18 }
  0x47   : > { %v852_v44 = vand.u32 (!%p1311_p7), 4294901760, %v851_v41 }
  0x48   : > { %v381_v28 = vsub.f32 (!%p1311_p7), %v379_v23, %v380_v26 }
  0x49   : > { %v853_v47 = vsub.f32 (!%p1311_p7), %v851_v41, %v852_v44 }
  0x4a   : > { %v382_v30 = vand.u32 (!%p1311_p7), 4294901760, %v381_v28 }
  0x4b   : > { %v854_v50 = vand.u32 (!%p1311_p7), 4294901760, %v853_v47 }
  0xcd   : > { %v265_v8 = vpop.xlane.xlu0 %264 }
  0xce   : > { %v276_v11 = vrot.slane %v265_v8, %v275_v9 }
  0xd1   : > { %v268_v10 = vpop.xlane.xlu0 %267  ;;  %290 = sbr.rel (%p1311_p7) target bundleno = 1072 (0x430), region = 52 }
  0xd2   : > { %v280_v13 = vrot.slane %v268_v10, %v275_v9 }
  0xd4   : > { %v282_v14 = vsel %vm281_vm2, %v280_v13, %v276_v11 }
  0xd5   : > { %v284_v15 = vadd.f32 %v282_v14, %v259_v12 }
  0xd7   : > { %286 = vst.msk [vmem:[#allocation2] sm:$0x3] %vm285_vm3, %v284_v15 }
  0xde   : > { %v291_v17 = vld [vmem:[#allocation2] sm:$0x3] }
  0xdf   : > { %v292_v20 = vmul.f32 0.00390625, %v291_v17 }
  0xe1   : > { %v296_v22 = vsel %vm294_vm5, %v292_v20, 0 }
  0xe2   : > { %v367_v24 = vand.u32 4294901760, %v296_v22 }
  0xe4   : > { %v368_v25 = vsub.f32 %v296_v22, %v367_v24 }
  0xe6   : > { %v369_v27 = vand.u32 4294901760, %v368_v25 }
  0xe8   : > { %v370_v29 = vsub.f32 %v368_v25, %v369_v27 }
  0xea   : > { %v371_v31 = vand.u32 4294901760, %v370_v29 }
  0xec   : > { %1345 = vmatmul.mubr.f32.vlgmr.msra.gmra.mrb[0].mxu0 %v371_v31 }
  0xed   : > { %1348 = vmatpush3.msra.mxu0 %v382_v30  ;;  %1349 = vmatprep.mubr.msk.f32.mxu0 %vm1612_vm4, %v1611_v18 }
  0xee   : > { %1352 = vmatprep.subr.mxu0 %v1611_v18 }
  0xf4   : > { %1350 = vmatmul.mubr.f32.vlgmr.msra.gmra.mrb[0].mxu0 %v367_v24 }
  0xf5   : > { %1353 = vmatpush3.msra.mxu0 %v379_v23  ;;  %1354 = vmatprep.mubr.msk.f32.mxu0 %vm1612_vm4, %v1611_v18 }
  0xf6   : > { %1357 = vmatprep.subr.mxu0 %v1611_v18 }
  0xfc   : > { %1355 = vmatmul.mubr.f32.vlgmr.msra.gmra.mrb[0].mxu0 %v368_v25 }
  0xfd   : > { %1358 = vmatpush3.msra.mxu0 %v302_v21  ;;  %1359 = vmatprep.mubr.msk.f32.mxu0 %vm1612_vm4, %v1611_v18 }
  0xfe   : > { %1362 = vmatprep.subr.mxu0 %v1611_v18 }
 0x104   : > { %1360 = vmatmul.mubr.f32.vlgmr.msra.gmra.mrb[0].mxu0 %v369_v27 }
 0x105   : > { %1363 = vmatpush3.msra.mxu0 %v380_v26  ;;  %1364 = vmatprep.mubr.msk.f32.mxu0 %vm1612_vm4, %v1611_v18 }
 0x106   : > { %1367 = vmatprep.subr.mxu0 %v1611_v18 }
 0x10c   : > { %1365 = vmatmul.mubr.f32.vlgmr.msra.gmra.mrb[0].mxu0 %v367_v24 }
 0x10d   : > { %1368 = vmatpush3.msra.mxu0 %v302_v21  ;;  %1369 = vmatprep.mubr.msk.f32.mxu0 %vm1612_vm4, %v1611_v18 }
 0x114   : > { %1370 = vmatmul.mubr.f32.vlgmr.msra.gmra.mrb[0].mxu0 %v367_v24 }
 0x1e7   : > { %v743_v36 = vpop.f32.mrb[0].mxu0 }
 0x1e8   : > { %v754_v38 = vmul.f32 %v1312_v35, %v743_v36  ;;  %v1371_v39 = vpop.f32.mrb[1].mxu0 }
 0x1ea   : > { %v762_v40 = vadd.f32 %v1313_v37, %v754_v38 }
 0x1ec   : > { %v763_v42 = vmax.f32 %v762_v40, 0.0 }
 0x1ee   : > { %v767_v43 = vsel %vm765_vm7, %v763_v42, 0 }
 0x1ef   : > { %v839_v45 = vand.u32 4294901760, %v767_v43 }
 0x1f1   : > { %v840_v46 = vsub.f32 %v767_v43, %v839_v45 }
 0x1f3   : > { %v841_v48 = vand.u32 4294901760, %v840_v46 }
 0x1f5   : > { %v842_v49 = vsub.f32 %v840_v46, %v841_v48 }
 0x1f7   : > { %v843_v51 = vand.u32 4294901760, %v842_v49 }
 0x1f9   : > { %1375 = vmatmul.mubr.f32.vlgmr.msra.gmra.mrb[0].mxu1 %v843_v51 }
 0x1fa   : > { %1378 = vmatpush3.msra.mxu1 %v854_v50  ;;  %1379 = vmatprep.mubr.msk.f32.mxu1 %vm1612_vm4, %v1611_v18 }
 0x1fb   : > { %1382 = vmatprep.subr.mxu1 %v1611_v18 }
 0x201   : > { %1380 = vmatmul.mubr.f32.vlgmr.msra.gmra.mrb[0].mxu1 %v839_v45 }
 0x202   : > { %1383 = vmatpush3.msra.mxu1 %v851_v41  ;;  %1384 = vmatprep.mubr.msk.f32.mxu1 %vm1612_vm4, %v1611_v18 }
 0x203   : > { %1387 = vmatprep.subr.mxu1 %v1611_v18 }
 0x209   : > { %1385 = vmatmul.mubr.f32.vlgmr.msra.gmra.mrb[0].mxu1 %v840_v46 }
 0x20a   : > { %1388 = vmatpush3.msra.mxu1 %v774_v34  ;;  %1389 = vmatprep.mubr.msk.f32.mxu1 %vm1612_vm4, %v1611_v18 }
 0x20b   : > { %1392 = vmatprep.subr.mxu1 %v1611_v18 }
 0x211   : > { %1390 = vmatmul.mubr.f32.vlgmr.msra.gmra.mrb[0].mxu1 %v841_v48 }
 0x212   : > { %1393 = vmatpush3.msra.mxu1 %v852_v44  ;;  %1394 = vmatprep.mubr.msk.f32.mxu1 %vm1612_vm4, %v1611_v18 }
 0x213   : > { %1397 = vmatprep.subr.mxu1 %v1611_v18 }
 0x219   : > { %1395 = vmatmul.mubr.f32.vlgmr.msra.gmra.mrb[0].mxu1 %v839_v45 }
 0x21a   : > { %1398 = vmatpush3.msra.mxu1 %v774_v34  ;;  %1399 = vmatprep.mubr.msk.f32.mxu1 %vm1612_vm4, %v1611_v18 }
 0x221   : > { %1400 = vmatmul.mubr.f32.vlgmr.msra.gmra.mrb[0].mxu1 %v839_v45 }
 0x2f4   : > { %v1215_v52 = vpop.f32.mrb[0].mxu1 }
 0x2f5   : > { %v1401_v53 = vpop.f32.mrb[1].mxu1  ;;  %v1219_v54 = vsel %vm285_vm3, %v1215_v52, -inf }
 0x2f6   : > { %1220 = vmax.xlane.f32.xlu0 %v1219_v54 }
 0x383   : > { %v1221_v55 = vpop.xlane.xlu0 %1220 }
 0x384   : > { %v1222_v56 = vsub.f32 %v1215_v52, %v1221_v55 }
 0x386   : > { %v1223_v57 = vmul.f32 1.442695, %v1222_v56 }
 0x388   : > { %1490 = vpow2.f32 %v1223_v57 }
 0x392   : > { %v1491_v58 = vpop.eup %1490 }
 0x393   : > { %v1225_v59 = vsel %vm285_vm3, %v1491_v58, 0.0 }
 0x394   : > { %1226 = vadd.xlane.f32.xlu0 %v1225_v59 }
 0x421   : > { %v1227_v60 = vpop.xlane.xlu0 %1226 }
 0x422   : > { %1492 = vrcp.f32 %v1227_v60 }
 0x42c   : > { %v1493_v61 = vpop.eup %1492 }
 0x42d   : > { %v1229_v62 = vmul.f32 %v1493_v61, %v1491_v58 }
 0x42f   : > { %1230 = vst.msk [vmem:[#allocation6] sm:$0x3] %vm285_vm3, %v1229_v62 }
 0x430 PF: > { %p1808_p9 = scmp.eq.s32.totalorder %s1303_s24, 1  ;;  %s1613_s8 = smov [#allocation6]  }
 0x431   : > { %s1240_s9 = sshll.u32 %s1613_s8, 4  ;;  %s1241_s9 = int_to_ptr.vmem [resolvable:$true] %s1240_s9 }
 0x432   : > { %s1524_s10 = scalar_lea.vmem %s1241_s9, 32  ;;  %p1531_p11 = scmp.lt.s32.totalorder %s1241_s9, %s1241_s9 }
 0x433   : > { %p1525_p5 = scmp.ne.s32.totalorder %s1241_s9, %s1524_s10  ;;  %p1532_p13 = scmp.lt.s32.totalorder %s1524_s10, %s1524_s10 }
 0x435   : > { %p1526_p6 = pnand %p1525_p5, %p1808_p9  ;;  %p1533_p1 = por %p1532_p13, %p1531_p11 }
 0x437   : > { %p1527_p8 = pneg %p1526_p6 }
 0x439   : > { %p1534_p2 = pnand %p1533_p1, %p1527_p8 }
 0x43b   : > { %1537 = shalt.err (!%p1534_p2)
}
 0x43c   : > { %s1538_s24 = scalar_lea.hbm %s1857_s5, 32 }
 0x43d   : > { %p1539_p3 = scmp.ne.s32.totalorder %s1857_s5, %s1538_s24  ;;  %p1544_p4 = scmp.lt.u32.totalorder %s1538_s24, %s1857_s5 }
 0x43f   : > { %p1540_p12 = pnand %p1539_p3, %p1808_p9 }
 0x441   : > { %p1541_p0 = pneg %p1540_p12 }
 0x443   : > { %p1546_p10 = pnand %p1544_p4, %p1541_p0 }
 0x445   : > { %1549 = shalt.err (!%p1546_p10)
}
 0x446   : > { %1425 = dma.vmem_to_hbm [thread:$0]  (%p1808_p9), %s1241_s9, 32, %s1857_s5, [#allocation5]  }
 0x447   : > { %1579 = dma.done.wait (%p1808_p9), [#allocation5], 32  }
 0x448   : > { %1581 = vsyncadd (%p1808_p9), [#allocation5], 4294967264 }
 0x449 PF: > { %s19_s23 = sadd.s32 1, %s1604_s23   ;;  %s1863_s18 = smov %s1588_s19 }
 0x44a   : > { %p16_p7 = scmp.ge.s32.totalorder %s19_s23, 4   ;;  %s1864_s19 = smov %s1592_s20 }
 0x44b   : > { %s1865_s20 = smov %s1695_s30  ;;  %s1866_s21 = smov %s1600_s22 }
 0x44c   : > { %s1867_s22 = smov %s1869_s25  ;;  %18 = sbr.rel (!%p16_p7) target bundleno = 5 (0x5), region = 86 }
 0x453   :  { %1253 = vsyncpa [#allocation4], 1 }
 0x454   :  { %1255 = vsyncpa [#allocation4 + $0x1], 1 }
 0x455   :  { %1256 = vsyncpa [#allocation5], 1 }
 0x456   :  { %1258 = vsyncpa [#allocation5 + $0x1], 1 }

</bundles_post_ra>
